<compile_context>
chip_gen: v6e
topology: v6e:2x2x1
jax: 0.10.0
libtpu: 0.0.40
codegen_flags: <defaults>
</compile_context>

<pallas_src>
import jax
import jax.numpy as jnp
from jax.experimental import pallas as pl
from jax.experimental.pallas import tpu as pltpu

HID = 256
Q_PAD = 128  # lane-dense padded width of the scalar Q head


def softq_kernel(x_ref, a_ref, w1x_ref, w1a_ref, b1_ref,
                 w2_ref, b2_ref, w3_ref, b3_ref, q_ref):
    # fc1 on concat(x, a):  concat([x, a]) @ W1 == x @ W1[:obs] + a @ W1[obs:]
    h1 = jnp.dot(x_ref[...], w1x_ref[...], preferred_element_type=jnp.float32)
    h1 = h1 + jnp.dot(a_ref[...], w1a_ref[...], preferred_element_type=jnp.float32)
    h1 = jnp.maximum(h1 + b1_ref[...], 0.0)                      # f32 [TB, 256]

    h2 = jnp.dot(h1.astype(jnp.bfloat16), w2_ref[...],
                 preferred_element_type=jnp.float32)
    h2 = jnp.maximum(h2 + b2_ref[...], 0.0)                      # f32 [TB, 256]

    q = jnp.dot(h2.astype(jnp.bfloat16), w3_ref[...],
                preferred_element_type=jnp.float32)              # f32 [TB, 128]
    q_ref[...] = (q + b3_ref[...]).astype(q_ref.dtype)


def _pick_batch_tile(b):
    # Prefer 128 so large batches produce >=2 grid steps (megacore on v7x);
    # anything that doesn't divide cleanly runs as a single full-batch tile.
    for tb in (128, 256, 512):
        if b % tb == 0:
            return tb
    return b


def softq_forward(x, a, params):
    """x: [B, obs_dim] f32, a: [B, act_dim] f32 -> q: [B, 1] f32."""
    b, obs_dim = x.shape
    _, act_dim = a.shape
    hid = params["w1x"].shape[1]
    tb = _pick_batch_tile(b)
    n_tiles = b // tb

    xb = x.astype(jnp.bfloat16)
    ab = a.astype(jnp.bfloat16)

    tile = lambda shape: pl.BlockSpec(shape, lambda i: (i, 0))       # batch-tiled
    resident = lambda shape: pl.BlockSpec(shape, lambda i: (0, 0))   # VMEM-resident

    flops = 2 * b * (obs_dim * hid + act_dim * hid + hid * hid + hid * Q_PAD)
    bytes_accessed = (int(xb.size) * 2 + int(ab.size) * 2
                      + sum(int(v.size) * v.dtype.itemsize for v in params.values())
                      + b * Q_PAD * 4)

    q_padded = pl.pallas_call(
        softq_kernel,
        out_shape=jax.ShapeDtypeStruct((b, Q_PAD), jnp.float32),
        grid=(n_tiles,),
        in_specs=[
            tile((tb, obs_dim)),
            tile((tb, act_dim)),
            resident((obs_dim, hid)),
            resident((act_dim, hid)),
            resident((1, hid)),
            resident((hid, hid)),
            resident((1, hid)),
            resident((hid, Q_PAD)),
            resident((1, Q_PAD)),
        ],
        out_specs=tile((tb, Q_PAD)),
        compiler_params=pltpu.CompilerParams(
            dimension_semantics=("parallel",)),
        cost_estimate=pl.CostEstimate(
            flops=flops, transcendentals=0, bytes_accessed=bytes_accessed),
    )(xb, ab,
      params["w1x"], params["w1a"], params["b1"],
      params["w2"], params["b2"],
      params["w3"], params["b3"])

    return q_padded[:, :1]


def make_params(key, obs_dim, act_dim, hid=HID):
    """Deterministic synthetic parameters (PyTorch-Linear-like init), [in, out] layout."""
    ks = jax.random.split(key, 6)

    def lin(kw, kb, fan_in, fan_out):
        bound = 1.0 / jnp.sqrt(jnp.float32(fan_in))
        w = jax.random.uniform(kw, (fan_in, fan_out), jnp.float32, -bound, bound)
        bb = jax.random.uniform(kb, (1, fan_out), jnp.float32, -bound, bound)
        return w, bb

    in_dim = obs_dim + act_dim
    w1, b1 = lin(ks[0], ks[1], in_dim, hid)
    w2, b2 = lin(ks[2], ks[3], hid, hid)
    w3, b3 = lin(ks[4], ks[5], hid, 1)

    # Split fc1 weight so the kernel never concatenates x and a.
    w1x, w1a = w1[:obs_dim], w1[obs_dim:]
    # Pad the scalar head to 128 lanes (zeros) for lane-dense output stores.
    w3p = jnp.zeros((hid, Q_PAD), jnp.float32).at[:, :1].set(w3)
    b3p = jnp.zeros((1, Q_PAD), jnp.float32).at[:, :1].set(b3)

    return dict(
        w1x=w1x.astype(jnp.bfloat16), w1a=w1a.astype(jnp.bfloat16), b1=b1,
        w2=w2.astype(jnp.bfloat16), b2=b2,
        w3=w3p.astype(jnp.bfloat16), b3=b3p,
    )


def softq_forward_ref(x, a, p):
    """Pure-JAX reference using the same bf16 matmul inputs / f32 accumulation."""
    h1 = (jnp.dot(x.astype(jnp.bfloat16), p["w1x"], preferred_element_type=jnp.float32)
          + jnp.dot(a.astype(jnp.bfloat16), p["w1a"], preferred_element_type=jnp.float32))
    h1 = jnp.maximum(h1 + p["b1"], 0.0)
    h2 = jnp.maximum(
        jnp.dot(h1.astype(jnp.bfloat16), p["w2"], preferred_element_type=jnp.float32)
        + p["b2"], 0.0)
    q = jnp.dot(h2.astype(jnp.bfloat16), p["w3"], preferred_element_type=jnp.float32) + p["b3"]
    return q[:, :1]


if __name__ == "__main__":
    key = jax.random.PRNGKey(0)
    kx, ka, kp = jax.random.split(key, 3)

    batch, obs_dim, act_dim = 8, 17, 6   # small MuJoCo-like shapes (e.g. HalfCheetah)
    x = jax.random.normal(kx, (batch, obs_dim), jnp.float32)
    a = jax.random.normal(ka, (batch, act_dim), jnp.float32)
    params = make_params(kp, obs_dim, act_dim)

    q = softq_forward(x, a, params)
    jax.block_until_ready(q)

    q_ref = softq_forward_ref(x, a, params)
    assert q.shape == (batch, 1)
    assert jnp.allclose(q, q_ref, atol=1e-2, rtol=1e-2)

    print("KERNEL_OK")
</pallas_src>

<mosaic_0001>
module attributes {stable_mosaic.version = 11 : i64} {
  func.func @softq_kernel(%arg0: i32, %arg1: memref<8x17xbf16, #tpu.memory_space<vmem>>, %arg2: memref<8x6xbf16, #tpu.memory_space<vmem>>, %arg3: memref<17x256xbf16, #tpu.memory_space<vmem>>, %arg4: memref<6x256xbf16, #tpu.memory_space<vmem>>, %arg5: memref<1x256xf32, #tpu.memory_space<vmem>>, %arg6: memref<256x256xbf16, #tpu.memory_space<vmem>>, %arg7: memref<1x256xf32, #tpu.memory_space<vmem>>, %arg8: memref<256x128xbf16, #tpu.memory_space<vmem>>, %arg9: memref<1x128xf32, #tpu.memory_space<vmem>>, %arg10: memref<8x128xf32, #tpu.memory_space<vmem>>) attributes {dimension_semantics = [#tpu.dimension_semantics<parallel>], iteration_bounds = array<i64: 1>, scalar_prefetch = 0 : i64, scratch_operands = 0 : i64, tpu.core_type = #tpu.core_type<tc>, window_params = [{transform_indices = @transform_0, window_bounds = array<i64: 8, 17>}, {transform_indices = @transform_1, window_bounds = array<i64: 8, 6>}, {pipeline_mode = #tpu.pipeline_mode<synchronous>, transform_indices = @transform_2, window_bounds = array<i64: 17, 256>}, {pipeline_mode = #tpu.pipeline_mode<synchronous>, transform_indices = @transform_3, window_bounds = array<i64: 6, 256>}, {pipeline_mode = #tpu.pipeline_mode<synchronous>, transform_indices = @transform_4, window_bounds = array<i64: 1, 256>}, {pipeline_mode = #tpu.pipeline_mode<synchronous>, transform_indices = @transform_5, window_bounds = array<i64: 256, 256>}, {pipeline_mode = #tpu.pipeline_mode<synchronous>, transform_indices = @transform_6, window_bounds = array<i64: 1, 256>}, {pipeline_mode = #tpu.pipeline_mode<synchronous>, transform_indices = @transform_7, window_bounds = array<i64: 256, 128>}, {pipeline_mode = #tpu.pipeline_mode<synchronous>, transform_indices = @transform_8, window_bounds = array<i64: 1, 128>}, {transform_indices = @transform_9, window_bounds = array<i64: 8, 128>}]} {
    %c0 = arith.constant 0 : index
    %c0_0 = arith.constant 0 : index
    %0 = vector.load %arg1[%c0, %c0_0] : memref<8x17xbf16, #tpu.memory_space<vmem>>, vector<8x17xbf16>
    %c0_1 = arith.constant 0 : index
    %c0_2 = arith.constant 0 : index
    %1 = vector.load %arg3[%c0_1, %c0_2] : memref<17x256xbf16, #tpu.memory_space<vmem>>, vector<17x256xbf16>
    %cst = arith.constant dense<0.000000e+00> : vector<8x256xf32>
    %2 = tpu.matmul %0, %1, %cst {dimension_numbers = #tpu.dot_dimension_numbers<[1], [0], [0], [1], [0, 0, 1, 1], [], []>} : vector<8x17xbf16>, vector<17x256xbf16>, vector<8x256xf32> -> vector<8x256xf32>
    %c0_3 = arith.constant 0 : index
    %c0_4 = arith.constant 0 : index
    %3 = vector.load %arg2[%c0_3, %c0_4] : memref<8x6xbf16, #tpu.memory_space<vmem>>, vector<8x6xbf16>
    %c0_5 = arith.constant 0 : index
    %c0_6 = arith.constant 0 : index
    %4 = vector.load %arg4[%c0_5, %c0_6] : memref<6x256xbf16, #tpu.memory_space<vmem>>, vector<6x256xbf16>
    %cst_7 = arith.constant dense<0.000000e+00> : vector<8x256xf32>
    %5 = tpu.matmul %3, %4, %cst_7 {dimension_numbers = #tpu.dot_dimension_numbers<[1], [0], [0], [1], [0, 0, 1, 1], [], []>} : vector<8x6xbf16>, vector<6x256xbf16>, vector<8x256xf32> -> vector<8x256xf32>
    %6 = arith.addf %2, %5 : vector<8x256xf32>
    %c0_8 = arith.constant 0 : index
    %c0_9 = arith.constant 0 : index
    %7 = vector.load %arg5[%c0_8, %c0_9] : memref<1x256xf32, #tpu.memory_space<vmem>>, vector<1x256xf32>
    %8 = vector.broadcast %7 : vector<1x256xf32> to vector<8x256xf32>
    %9 = arith.addf %6, %8 : vector<8x256xf32>
    %cst_10 = arith.constant 0.000000e+00 : f32
    %10 = vector.broadcast %cst_10 : f32 to vector<8x256xf32>
    %11 = arith.maximumf %9, %10 : vector<8x256xf32>
    %12 = arith.truncf %11 : vector<8x256xf32> to vector<8x256xbf16>
    %c0_11 = arith.constant 0 : index
    %c0_12 = arith.constant 0 : index
    %13 = vector.load %arg6[%c0_11, %c0_12] : memref<256x256xbf16, #tpu.memory_space<vmem>>, vector<256x256xbf16>
    %cst_13 = arith.constant dense<0.000000e+00> : vector<8x256xf32>
    %14 = tpu.matmul %12, %13, %cst_13 {dimension_numbers = #tpu.dot_dimension_numbers<[1], [0], [0], [1], [0, 0, 1, 1], [], []>} : vector<8x256xbf16>, vector<256x256xbf16>, vector<8x256xf32> -> vector<8x256xf32>
    %c0_14 = arith.constant 0 : index
    %c0_15 = arith.constant 0 : index
    %15 = vector.load %arg7[%c0_14, %c0_15] : memref<1x256xf32, #tpu.memory_space<vmem>>, vector<1x256xf32>
    %16 = vector.broadcast %15 : vector<1x256xf32> to vector<8x256xf32>
    %17 = arith.addf %14, %16 : vector<8x256xf32>
    %cst_16 = arith.constant 0.000000e+00 : f32
    %18 = vector.broadcast %cst_16 : f32 to vector<8x256xf32>
    %19 = arith.maximumf %17, %18 : vector<8x256xf32>
    %20 = arith.truncf %19 : vector<8x256xf32> to vector<8x256xbf16>
    %c0_17 = arith.constant 0 : index
    %c0_18 = arith.constant 0 : index
    %21 = vector.load %arg8[%c0_17, %c0_18] : memref<256x128xbf16, #tpu.memory_space<vmem>>, vector<256x128xbf16>
    %cst_19 = arith.constant dense<0.000000e+00> : vector<8x128xf32>
    %22 = tpu.matmul %20, %21, %cst_19 {dimension_numbers = #tpu.dot_dimension_numbers<[1], [0], [0], [1], [0, 0, 1, 1], [], []>} : vector<8x256xbf16>, vector<256x128xbf16>, vector<8x128xf32> -> vector<8x128xf32>
    %c0_20 = arith.constant 0 : index
    %c0_21 = arith.constant 0 : index
    %23 = vector.load %arg9[%c0_20, %c0_21] : memref<1x128xf32, #tpu.memory_space<vmem>>, vector<1x128xf32>
    %24 = vector.broadcast %23 : vector<1x128xf32> to vector<8x128xf32>
    %25 = arith.addf %22, %24 : vector<8x128xf32>
    %c0_22 = arith.constant 0 : index
    %c0_23 = arith.constant 0 : index
    %26 = vector.load %arg10[%c0_22, %c0_23] : memref<8x128xf32, #tpu.memory_space<vmem>>, vector<8x128xf32>
    tpu.vector_store %arg10[%c0_22, %c0_23], %25 {strides = array<i32>} : memref<8x128xf32, #tpu.memory_space<vmem>>, vector<8x128xf32>,
    return
  }
  func.func @transform_0(%arg0: i32) -> (i32, i32) {
    %c0_i32 = arith.constant 0 : i32
    %c0_i32_0 = arith.constant 0 : i32
    return %arg0, %c0_i32 : i32, i32
  }
  func.func @transform_1(%arg0: i32) -> (i32, i32) {
    %c0_i32 = arith.constant 0 : i32
    %c0_i32_0 = arith.constant 0 : i32
    return %arg0, %c0_i32 : i32, i32
  }
  func.func @transform_2(%arg0: i32) -> (i32, i32) {
    %c0_i32 = arith.constant 0 : i32
    %c0_i32_0 = arith.constant 0 : i32
    %c0_i32_1 = arith.constant 0 : i32
    return %c0_i32, %c0_i32_0 : i32, i32
  }
  func.func @transform_3(%arg0: i32) -> (i32, i32) {
    %c0_i32 = arith.constant 0 : i32
    %c0_i32_0 = arith.constant 0 : i32
    %c0_i32_1 = arith.constant 0 : i32
    return %c0_i32, %c0_i32_0 : i32, i32
  }
  func.func @transform_4(%arg0: i32) -> (i32, i32) {
    %c0_i32 = arith.constant 0 : i32
    %c0_i32_0 = arith.constant 0 : i32
    %c0_i32_1 = arith.constant 0 : i32
    return %c0_i32, %c0_i32_0 : i32, i32
  }
  func.func @transform_5(%arg0: i32) -> (i32, i32) {
    %c0_i32 = arith.constant 0 : i32
    %c0_i32_0 = arith.constant 0 : i32
    %c0_i32_1 = arith.constant 0 : i32
    return %c0_i32, %c0_i32_0 : i32, i32
  }
  func.func @transform_6(%arg0: i32) -> (i32, i32) {
    %c0_i32 = arith.constant 0 : i32
    %c0_i32_0 = arith.constant 0 : i32
    %c0_i32_1 = arith.constant 0 : i32
    return %c0_i32, %c0_i32_0 : i32, i32
  }
  func.func @transform_7(%arg0: i32) -> (i32, i32) {
    %c0_i32 = arith.constant 0 : i32
    %c0_i32_0 = arith.constant 0 : i32
    %c0_i32_1 = arith.constant 0 : i32
    return %c0_i32, %c0_i32_0 : i32, i32
  }
  func.func @transform_8(%arg0: i32) -> (i32, i32) {
    %c0_i32 = arith.constant 0 : i32
    %c0_i32_0 = arith.constant 0 : i32
    %c0_i32_1 = arith.constant 0 : i32
    return %c0_i32, %c0_i32_0 : i32, i32
  }
  func.func @transform_9(%arg0: i32) -> (i32, i32) {
    %c0_i32 = arith.constant 0 : i32
    %c0_i32_0 = arith.constant 0 : i32
    return %arg0, %c0_i32 : i32, i32
  }
}

</mosaic_0001>

<bundles_post_ra>
// kernel: tpu_custom_call.1
= control target key start
LH: loop header
LB: loop body
LE: loop exit
PB: predicated region body
PF: predicated region fallthrough
CT: control target
= control target key end

     0   :  { %14 = vsyncpa [#allocation3], 0  ;;  %s1108_s0 = inlined_call_operand.hbm [shape: bf16[8,17], index: 0, kind: input, shape index: {}]   ;;  %s1109_s1 = inlined_call_operand.hbm [shape: bf16[8,6], index: 1, kind: input, shape index: {}]   ;;  %s1110_s2 = inlined_call_operand.hbm [shape: bf16[17,256], index: 2, kind: input, shape index: {}]   ;;  %s1111_s3 = inlined_call_operand.hbm [shape: bf16[6,256], index: 3, kind: input, shape index: {}]   ;;  %s1112_s4 = inlined_call_operand.vmem [shape: f32[1,256], index: 4, kind: input, shape index: {}]   ;;  %s1113_s5 = inlined_call_operand.hbm [shape: bf16[256,256], index: 5, kind: input, shape index: {}]   ;;  %s1114_s6 = inlined_call_operand.vmem [shape: f32[1,256], index: 6, kind: input, shape index: {}]   ;;  %s1115_s7 = inlined_call_operand.hbm [shape: bf16[256,128], index: 7, kind: input, shape index: {}]   ;;  %s1116_s8 = inlined_call_operand.vmem [shape: f32[1,128], index: 8, kind: input, shape index: {}]   ;;  %s1117_s9 = inlined_call_operand.hbm [shape: f32[8,128], index: 9, kind: output, shape index: {}]  }
   0x1   :  { %15 = vsyncpa [#allocation6], 0 }
   0x2   :  { %16 = vsyncpa [#allocation9], 0 }
   0x3   :  { %17 = vsyncpa [#allocation12], 0 }
   0x4   :  { %18 = vsyncpa [#allocation4], 0  ;;  %s1016_s30 = smov [#allocation5]   ;;  %s1017_s11 = smov [#allocation8]  }
   0x5   :  { %s35_s10 = sshll.u32 %s1016_s30, 4  ;;  %s57_s12 = sshll.u32 %s1017_s11, 4  ;;  %s36_s10 = int_to_ptr.vmem [resolvable:$true] %s35_s10  ;;  %s58_s12 = int_to_ptr.vmem [resolvable:$true] %s57_s12 }
   0x6   :  { %s874_s13 = scalar_lea.vmem %s36_s10, 64  ;;  %p879_p1 = scmp.lt.s32.totalorder %s36_s10, %s36_s10 }
   0x7   :  { %p875_p0 = scmp.ne.s32.totalorder %s36_s10, %s874_s13  ;;  %p880_p2 = scmp.lt.s32.totalorder %s874_s13, %s874_s13 }
   0x9   :  { %p881_p3 = por %p880_p2, %p879_p1 }
   0xb   :  { %p882_p4 = pnand %p881_p3, %p875_p0 }
   0xd   :  { %885 = shalt.err (!%p882_p4)
}
   0xe   :  { %38 = dma.hbm_to_vmem [thread:$0]  %s1109_s1, 64, %s36_s10, [#allocation6]  }
   0xf   :  { %s894_s16 = scalar_lea.vmem %s58_s12, 128  ;;  %p899_p6 = scmp.lt.s32.totalorder %s58_s12, %s58_s12 }
  0x10   :  { %p895_p5 = scmp.ne.s32.totalorder %s58_s12, %s894_s16  ;;  %p900_p7 = scmp.lt.s32.totalorder %s894_s16, %s894_s16 }
  0x12   :  { %p901_p8 = por %p900_p7, %p899_p6 }
  0x14   :  { %p902_p9 = pnand %p901_p8, %p895_p5 }
  0x16   :  { %905 = shalt.err (!%p902_p9)
}
  0x17   :  { %60 = dma.hbm_to_vmem [thread:$0]  %s1111_s3, 128, %s58_s12, [#allocation9]  }
  0x18   :  { %s1018_s19 = smov [#allocation2]   ;;  %s1019_s21 = smov [#allocation7]  }
  0x19   :  { %s25_s20 = sshll.u32 %s1018_s19, 4  ;;  %s44_s22 = sshll.u32 %s1019_s21, 4  ;;  %s26_s20 = int_to_ptr.vmem [resolvable:$true] %s25_s20  ;;  %s45_s22 = int_to_ptr.vmem [resolvable:$true] %s44_s22 }
  0x1a   :  { %s914_s23 = scalar_lea.vmem %s26_s20, 64  ;;  %p919_p11 = scmp.lt.s32.totalorder %s26_s20, %s26_s20 }
  0x1b   :  { %p915_p10 = scmp.ne.s32.totalorder %s26_s20, %s914_s23  ;;  %p920_p12 = scmp.lt.s32.totalorder %s914_s23, %s914_s23 }
  0x1d   :  { %p921_p13 = por %p920_p12, %p919_p11 }
  0x1f   :  { %p922_p0 = pnand %p921_p13, %p915_p10 }
  0x21   :  { %925 = shalt.err (!%p922_p0)
}
  0x22   :  { %28 = dma.hbm_to_vmem [thread:$0]  %s1108_s0, 64, %s26_s20, [#allocation3]  }
  0x23   :  { %s934_s25 = scalar_lea.vmem %s45_s22, 384  ;;  %p939_p2 = scmp.lt.s32.totalorder %s45_s22, %s45_s22 }
  0x24   :  { %p935_p1 = scmp.ne.s32.totalorder %s45_s22, %s934_s25  ;;  %p940_p3 = scmp.lt.s32.totalorder %s934_s25, %s934_s25 }
  0x26   :  { %p941_p4 = por %p940_p3, %p939_p2 }
  0x28   :  { %p942_p5 = pnand %p941_p4, %p935_p1 }
  0x2a   :  { %945 = shalt.err (!%p942_p5)
}
  0x2b   :  { %s1020_s3 = smov 128   ;;  %s1021_s26 = smov 8  }
  0x2c   :  { %50 = dma.hbm_to_vmem [thread:$0]  %s1110_s2, 384, %s45_s22, [#allocation6], %s1020_s3, %s1020_s3, %s1021_s26  }
  0x2d   :  { %s1022_s29 = smov [#allocation10]   ;;  %s1023_s10 = smov [#allocation11]  }
  0x2e   :  { %s68_s30 = sshll.u32 %s1022_s29, 4  ;;  %s82_s11 = sshll.u32 %s1023_s10, 4  ;;  %s69_s30 = int_to_ptr.vmem [resolvable:$true] %s68_s30  ;;  %s83_s11 = int_to_ptr.vmem [resolvable:$true] %s82_s11 }
  0x2f   :  { %s954_s0 = scalar_lea.vmem %s69_s30, 4096  ;;  %p959_p7 = scmp.lt.s32.totalorder %s69_s30, %s69_s30 }
  0x30   :  { %p955_p6 = scmp.ne.s32.totalorder %s69_s30, %s954_s0  ;;  %p960_p8 = scmp.lt.s32.totalorder %s954_s0, %s954_s0 }
  0x32   :  { %p961_p9 = por %p960_p8, %p959_p7 }
  0x34   :  { %p962_p10 = pnand %p961_p9, %p955_p6 }
  0x36   :  { %965 = shalt.err (!%p962_p10)
}
  0x37   :  { %74 = dma.hbm_to_vmem [thread:$0]  %s1113_s5, 4096, %s69_s30, [#allocation9], %s1020_s3, %s1020_s3, %s1021_s26  }
  0x38   :  { %s974_s14 = scalar_lea.vmem %s83_s11, 2048  ;;  %p979_p12 = scmp.lt.s32.totalorder %s83_s11, %s83_s11 }
  0x39   :  { %p975_p11 = scmp.ne.s32.totalorder %s83_s11, %s974_s14  ;;  %p980_p13 = scmp.lt.s32.totalorder %s974_s14, %s974_s14 }
  0x3b   :  { %p981_p0 = por %p980_p13, %p979_p12 }
  0x3d   :  { %p982_p1 = pnand %p981_p0, %p975_p11 }
  0x3f   :  { %985 = shalt.err (!%p982_p1)
}
  0x40   :  { %s1024_s2 = smov 64   ;;  %s1025_s15 = smov 4  }
  0x41   :  { %88 = dma.hbm_to_vmem [thread:$0]  %s1115_s7, 2048, %s83_s11, [#allocation12], %s1024_s2, %s1024_s2, %s1025_s15  }
  0x42   :  { %1006 = dma.done.wait [#allocation3], 64  }
  0x43   :  { %1007 = vsyncadd [#allocation3], 4294967232 }
  0x44   :  { %1008 = dma.done.wait [#allocation6], 448  }
  0x45   :  { %1009 = vsyncadd [#allocation6], 4294966848 }
  0x46   :  { %1010 = dma.done.wait [#allocation9], 4224  }
  0x47   :  { %1011 = vsyncadd [#allocation9], 4294963072 }
  0x48   :  { %1012 = dma.done.wait [#allocation12], 2048  }
  0x49   :  { %1013 = vsyncadd [#allocation12], 4294965248  ;;  %v1026_v0 = vmov 0   ;;  %vm192_vm0 = vcmask 1040384   ;;  %v115_v1 = vld [vmem:[#allocation8] sm:$0x77]  ;;  %v244_v59 = vlaneseq }
  0x4a   :  { %164 = vmatprep.mubr.bf16.mxu1 %v1026_v0  ;;  %vm125_vm1 = vcmask 1042432   ;;  %v113_v2 = vld [vmem:[#allocation7 + $0x10] sm:$0x11]  ;;  %v194_v3 = vsel %vm192_vm0, 65535, %v1026_v0  ;;  %v704_v4 = vcombine.high %v115_v1, %v115_v1  ;;  %v703_v5 = vcombine.low %v115_v1, %v115_v1  ;;  %v114_v8 = vld [vmem:[#allocation5] sm:$0xf] }
  0x4b   :  { %v709_v6 = vcombine.low %v113_v2, %v113_v2  ;;  %v710_v7 = vcombine.high %v113_v2, %v113_v2  ;;  %v802_v11 = vld [vmem:[#allocation10 + $0x74] ss:$8 sps:$4 sm:$0xff]   ;;  %v804_v12 = vld [vmem:[#allocation10 + $0x70] ss:$8 sps:$4 sm:$0xff]   ;;  %vm121_vm2 = vcmask 48128   ;;  %vm188_vm3 = vcmask 138240  }
  0x4c   :  { %705 = vmatprep.subr.msk.bf16.mxu1 %vm125_vm1, %v704_v4  ;;  %v127_v9 = vsel %vm125_vm1, %v703_v5, 0  ;;  %v805_v14 = vld [vmem:[#allocation10 + $0x64] ss:$8 sps:$4 sm:$0xff]   ;;  %464 = vmatprep.subr.bf16.mxu0 %v802_v11  ;;  %v807_v16 = vld [vmem:[#allocation10 + $0x60] ss:$8 sps:$4 sm:$0xff]   ;;  %v850_v47 = vld [vmem:[#allocation11 + $0x78] sm:$0xff]  }
  0x4d   :  { %v199_v10 = vand.u32 %v710_v7, %v194_v3  ;;  %147 = vmatpush1.bf16.msra.mxu1 %v127_v9  ;;  %v196_v13 = vand.u32 %v709_v6, %v194_v3  ;;  %v801_v15 = vld [vmem:[#allocation7 + $0x4] ss:$8 sps:$4 sm:$0xff]   ;;  %465 = vmatpush1.bf16.msra.mxu0 %v804_v12  ;;  %v808_v17 = vld [vmem:[#allocation10 + $0x54] ss:$8 sps:$4 sm:$0xff]   ;;  %v799_v18 = vld [vmem:[#allocation7] ss:$8 sps:$4 sm:$0xff]  }
  0x4e   :  { %466 = vmatprep.subr.bf16.mxu0 %v805_v14  ;;  %v810_v19 = vld [vmem:[#allocation10 + $0x50] ss:$8 sps:$4 sm:$0xff]   ;;  %v811_v20 = vld [vmem:[#allocation10 + $0x44] ss:$8 sps:$4 sm:$0xff]   ;;  %v813_v22 = vld [vmem:[#allocation10 + $0x40] ss:$8 sps:$4 sm:$0xff]  }
  0x4f   :  { %213 = vmatprep.subr.bf16.mxu1 %v199_v10  ;;  %v110_v21 = vld [vmem:[#allocation2] sm:$0xf]  ;;  %v814_v23 = vld [vmem:[#allocation10 + $0x34] ss:$8 sps:$4 sm:$0xff]   ;;  %v817_v25 = vld [vmem:[#allocation10 + $0x24] ss:$8 sps:$4 sm:$0xff]  }
  0x50   :  { %706 = vmatmul.mubr.msk.bf16.vlgmr.msra.gmra.mxu1 %vm121_vm2, %v114_v8  ;;  %v816_v24 = vld [vmem:[#allocation10 + $0x30] ss:$8 sps:$4 sm:$0xff]   ;;  %v819_v26 = vld [vmem:[#allocation10 + $0x20] ss:$8 sps:$4 sm:$0xff]   ;;  %v820_v27 = vld [vmem:[#allocation10 + $0x14] ss:$8 sps:$4 sm:$0xff]  }
  0x51   :  { %214 = vmatpush1.bf16.msra.mxu1 %v196_v13  ;;  %233 = vmatprep.mubr.bf16.mxu1 %v1026_v0  ;;  %v822_v28 = vld [vmem:[#allocation10 + $0x10] ss:$8 sps:$4 sm:$0xff]   ;;  %v823_v29 = vld [vmem:[#allocation10 + $0x4] ss:$8 sps:$4 sm:$0xff]   ;;  %v825_v30 = vld [vmem:[#allocation10] ss:$8 sps:$4 sm:$0xff]  }
  0x52   :  { %215 = vmatprep.subr.bf16.mxu1 %v801_v15  ;;  %467 = vmatpush1.bf16.msra.mxu0 %v807_v16  ;;  %v826_v31 = vld [vmem:[#allocation10 + $0xf4] ss:$8 sps:$4 sm:$0xff]   ;;  %v828_v32 = vld [vmem:[#allocation10 + $0xf0] ss:$8 sps:$4 sm:$0xff]   ;;  %v829_v33 = vld [vmem:[#allocation10 + $0xe4] ss:$8 sps:$4 sm:$0xff]  }
  0x53   :  { %468 = vmatprep.subr.bf16.mxu0 %v808_v17  ;;  %v831_v34 = vld [vmem:[#allocation10 + $0xe0] ss:$8 sps:$4 sm:$0xff]   ;;  %v832_v35 = vld [vmem:[#allocation10 + $0xd4] ss:$8 sps:$4 sm:$0xff]   ;;  %v834_v36 = vld [vmem:[#allocation10 + $0xd0] ss:$8 sps:$4 sm:$0xff]  }
  0x54   :  { %v835_v37 = vld [vmem:[#allocation10 + $0xc4] ss:$8 sps:$4 sm:$0xff]   ;;  %v837_v38 = vld [vmem:[#allocation10 + $0xc0] ss:$8 sps:$4 sm:$0xff]   ;;  %v838_v39 = vld [vmem:[#allocation10 + $0xb4] ss:$8 sps:$4 sm:$0xff]  }
  0x55   :  { %216 = vmatpush1.bf16.msra.mxu1 %v799_v18  ;;  %v840_v40 = vld [vmem:[#allocation10 + $0xb0] ss:$8 sps:$4 sm:$0xff]   ;;  %v841_v41 = vld [vmem:[#allocation10 + $0xa4] ss:$8 sps:$4 sm:$0xff]   ;;  %v843_v42 = vld [vmem:[#allocation10 + $0xa0] ss:$8 sps:$4 sm:$0xff]  }
  0x56   :  { %469 = vmatpush1.bf16.msra.mxu0 %v810_v19  ;;  %v844_v43 = vld [vmem:[#allocation10 + $0x94] ss:$8 sps:$4 sm:$0xff]   ;;  %v846_v44 = vld [vmem:[#allocation10 + $0x90] ss:$8 sps:$4 sm:$0xff]   ;;  %v847_v45 = vld [vmem:[#allocation10 + $0x84] ss:$8 sps:$4 sm:$0xff]   ;;  %761 = vmatprep.subr.bf16.mxu1 %v850_v47 }
  0x57   :  { %470 = vmatprep.subr.bf16.mxu0 %v811_v20  ;;  %v849_v46 = vld [vmem:[#allocation10 + $0x80] ss:$8 sps:$4 sm:$0xff]   ;;  %v851_v48 = vld [vmem:[#allocation11 + $0x38] sm:$0xff]   ;;  %v852_v49 = vld [vmem:[#allocation11 + $0x70] sm:$0xff]   ;;  %v245_v60 = vshrl.u32 %v244_v59, 7 }
  0x58   :  { %711 = vmatmul.mubr.msk.bf16.vlgmr.msra.gmra.mxu1 %vm188_vm3, %v110_v21  ;;  %v853_v50 = vld [vmem:[#allocation11 + $0x30] sm:$0xff]   ;;  %v854_v51 = vld [vmem:[#allocation11 + $0x68] sm:$0xff]   ;;  %v856_v53 = vld [vmem:[#allocation11 + $0x60] sm:$0xff]  }
  0x59   :  { %762 = vmatpush3.bf16.msra.mxu1 %v851_v48  ;;  %v855_v52 = vld [vmem:[#allocation11 + $0x28] sm:$0xff]   ;;  %v857_v54 = vld [vmem:[#allocation11 + $0x20] sm:$0xff]   ;;  %v858_v55 = vld [vmem:[#allocation11 + $0x58] sm:$0xff]   ;;  %v246_v63 = vsub.s32 0, %v245_v60  ;;  %v250_v2 = vsub.s32 1, %v245_v60 }
  0x5a   :  { %471 = vmatpush1.bf16.msra.mxu0 %v813_v22  ;;  %763 = vmatprep.subr.bf16.mxu1 %v852_v49  ;;  %v859_v56 = vld [vmem:[#allocation11 + $0x18] sm:$0xff]   ;;  %v860_v57 = vld [vmem:[#allocation11 + $0x50] sm:$0xff]   ;;  %v862_v18 = vld [vmem:[#allocation11 + $0x48] sm:$0xff]  }
  0x5b   :  { %472 = vmatprep.subr.bf16.mxu0 %v814_v23  ;;  %v861_v58 = vld [vmem:[#allocation11 + $0x10] sm:$0xff]   ;;  %v242_v1 = vld [vmem:[%s1112_s4] sm:$0x3]  ;;  %v863_v19 = vld [vmem:[#allocation11 + $0x8] sm:$0xff]  }
  0x5c   :  { %v247_v4 = vrot.slane %v242_v1, %v246_v63  ;;  %v251_v7 = vrot.slane %v242_v1, %v250_v2  ;;  %v864_v20 = vld [vmem:[#allocation11 + $0x40] sm:$0xff]   ;;  %v292_v22 = vld [vmem:[%s1114_s6] sm:$0x3]  ;;  %s1027_s6 = smov [#allocation13]  }
  0x5d   :  { %764 = vmatpush3.bf16.msra.mxu1 %v853_v50  ;;  %v865_v21 = vld [vmem:[#allocation11] sm:$0xff]   ;;  %v297_v23 = vrot.slane %v292_v22, %v246_v63  ;;  %s691_s21 = sshll.u32 %s1027_s6, 4  ;;  %s692_s21 = int_to_ptr.vmem [resolvable:$true] %s691_s21 }
  0x5e   :  { %473 = vmatpush1.bf16.msra.mxu0 %v816_v24  ;;  %765 = vmatprep.subr.bf16.mxu1 %v854_v51  ;;  %v301_v24 = vrot.slane %v292_v22, %v250_v2  ;;  %s986_s22 = scalar_lea.vmem %s692_s21, 128  ;;  %p991_p3 = scmp.lt.s32.totalorder %s692_s21, %s692_s21 }
  0x5f   :  { %474 = vmatprep.subr.bf16.mxu0 %v817_v25  ;;  %p987_p2 = scmp.ne.s32.totalorder %s692_s21, %s986_s22  ;;  %p992_p4 = scmp.lt.s32.totalorder %s986_s22, %s986_s22 }
  0x61   :  { %766 = vmatpush3.bf16.msra.mxu1 %v855_v52  ;;  %p993_p5 = por %p992_p4, %p991_p3 }
  0x62   :  { %475 = vmatpush1.bf16.msra.mxu0 %v819_v26  ;;  %767 = vmatprep.subr.bf16.mxu1 %v856_v53 }
  0x63   :  { %476 = vmatprep.subr.bf16.mxu0 %v820_v27  ;;  %p994_p6 = pnand %p993_p5, %p987_p2 }
  0x65   :  { %768 = vmatpush3.bf16.msra.mxu1 %v857_v54 }
  0x66   :  { %477 = vmatpush1.bf16.msra.mxu0 %v822_v28  ;;  %769 = vmatprep.subr.bf16.mxu1 %v858_v55 }
  0x67   :  { %478 = vmatprep.subr.bf16.mxu0 %v823_v29 }
  0x69   :  { %770 = vmatpush3.bf16.msra.mxu1 %v859_v56 }
  0x6a   :  { %479 = vmatpush1.bf16.msra.mxu0 %v825_v30  ;;  %771 = vmatprep.subr.bf16.mxu1 %v860_v57 }
  0x6b   :  { %480 = vmatprep.subr.bf16.mxu0 %v826_v31 }
  0x6d   :  { %772 = vmatpush3.bf16.msra.mxu1 %v861_v58 }
  0x6e   :  { %481 = vmatpush2.bf16.msra.mxu0 %v828_v32  ;;  %773 = vmatprep.subr.bf16.mxu1 %v862_v18 }
  0x6f   :  { %482 = vmatprep.subr.bf16.mxu0 %v829_v33 }
  0x71   :  { %774 = vmatpush3.bf16.msra.mxu1 %v863_v19 }
  0x72   :  { %483 = vmatpush2.bf16.msra.mxu0 %v831_v34  ;;  %775 = vmatprep.subr.bf16.mxu1 %v864_v20 }
  0x73   :  { %484 = vmatprep.subr.bf16.mxu0 %v832_v35 }
  0x75   :  { %776 = vmatpush3.bf16.msra.mxu1 %v865_v21 }
  0x76   :  { %485 = vmatpush2.bf16.msra.mxu0 %v834_v36  ;;  %v744_v36 = vld [vmem:[%s1116_s8] ss:$0 sm:$0xff] }
  0x77   :  { %486 = vmatprep.subr.bf16.mxu0 %v835_v37 }
  0x7a   :  { %487 = vmatpush2.bf16.msra.mxu0 %v837_v38 }
  0x7b   :  { %488 = vmatprep.subr.bf16.mxu0 %v838_v39 }
  0x7e   :  { %489 = vmatpush2.bf16.msra.mxu0 %v840_v40 }
  0x7f   :  { %490 = vmatprep.subr.bf16.mxu0 %v841_v41 }
  0x82   :  { %491 = vmatpush2.bf16.msra.mxu0 %v843_v42 }
  0x83   :  { %492 = vmatprep.subr.bf16.mxu0 %v844_v43 }
  0x86   :  { %493 = vmatpush2.bf16.msra.mxu0 %v846_v44 }
  0x87   :  { %494 = vmatprep.subr.bf16.mxu0 %v847_v45 }
  0x8a   :  { %495 = vmatpush2.bf16.msra.mxu0 %v849_v46 }
 0x110   :  { %v166_v61 = vpop.f32.mrf.mxu1 }
 0x112   :  { %v168_v62 = vpop.f32.mrf.mxu1 }
 0x114   :  { %v170_v0 = vpop.f32.mrf.mxu1 }
 0x116   :  { %v171_v3 = vpop.f32.mrf.mxu1 }
 0x118   :  { %v235_v5 = vpop.f32.mrf.mxu1 }
 0x119   :  { %v236_v6 = vadd.f32 %v235_v5, %v166_v61 }
 0x11a   :  { %v237_v8 = vpop.f32.mrf.mxu1 }
 0x11b   :  { %v254_v9 = vadd.f32 %v247_v4, %v236_v6  ;;  %v238_v10 = vadd.f32 %v237_v8, %v168_v62 }
 0x11c   :  { %v239_v11 = vpop.f32.mrf.mxu1 }
 0x11d   :  { %v255_v12 = vadd.f32 %v251_v7, %v238_v10  ;;  %v256_v13 = vmax.f32 %v254_v9, 0.0 }
 0x11e   :  { %v240_v14 = vpop.f32.mrf.mxu1 }
 0x11f   :  { %v257_v15 = vmax.f32 %v255_v12, 0.0  ;;  %v258_v17 = vpack.c.bf16 %v256_v13, %v256_v13 }
 0x121   :  { %v259_v16 = vpack.c.bf16 %v257_v15, %v257_v15 }
 0x123   :  { %496 = vmatprep.mubr.bf16.mxu0 %v259_v16 }
 0x124   :  { %497 = vmatmul.mubr.bf16.vlgmr.msra.gmra.mxu0 %v258_v17 }
 0x1e4   :  { %v498_v25 = vpop.f32.mrf.mxu0 }
 0x1e5   :  { %v499_v26 = vadd.f32 %v498_v25, %v297_v23 }
 0x1e6   :  { %v500_v27 = vpop.f32.mrf.mxu0 }
 0x1e7   :  { %v501_v28 = vadd.f32 %v500_v27, %v301_v24  ;;  %v505_v29 = vmax.f32 %v499_v26, 0.0 }
 0x1e8   :  { %v502_v30 = vpop.f32.mrf.mxu0 }
 0x1e9   :  { %v506_v31 = vmax.f32 %v501_v28, 0.0  ;;  %v507_v34 = vpack.c.bf16 %v505_v29, %v505_v29 }
 0x1ea   :  { %v503_v32 = vpop.f32.mrf.mxu0 }
 0x1eb   :  { %v508_v33 = vpack.c.bf16 %v506_v31, %v506_v31 }
 0x1ed   :  { %676 = vmatprep.mubr.bf16.mxu1 %v508_v33 }
 0x1ee   :  { %677 = vmatmul.mubr.bf16.vlgmr.msra.gmra.mxu1 %v507_v34 }
 0x2ae   :  { %v777_v35 = vpop.f32.mrf.mxu1 }
 0x2b0   :  { %v778_v37 = vpop.f32.mrf.mxu1 }
 0x2b1   :  { %v779_v38 = vadd.f32 %v778_v37, %v777_v35 }
 0x2b2   :  { %v780_v39 = vpop.f32.mrf.mxu1 }
 0x2b3   :  { %v679_v40 = vadd.f32 %v779_v38, %v744_v36 }
 0x2b4   :  { %v781_v41 = vpop.f32.mrf.mxu1 }
 0x2b5   :  { %684 = vst [vmem:[#allocation13] sm:$0xff] %v679_v40 }
 0x2b6   :  { %997 = shalt.err (!%p994_p6)
}
 0x2b7   :  { %694 = dma.vmem_to_hbm [thread:$0]  %s692_s21, 128, %s1117_s9, [#allocation4]  }
 0x2b8   :  { %1014 = dma.done.wait [#allocation4], 128  }
 0x2b9   :  { %1015 = vsyncadd [#allocation4], 4294967168 }
 0x2ba   :  { %698 = vsyncpa [#allocation3], 1 }
 0x2bb   :  { %699 = vsyncpa [#allocation6], 1 }
 0x2bc   :  { %700 = vsyncpa [#allocation9], 1 }
 0x2bd   :  { %701 = vsyncpa [#allocation12], 1 }
 0x2be   :  { %702 = vsyncpa [#allocation4], 1 }

</bundles_post_ra>
